<compile_context>
chip_gen: v7x
topology: tpu7x:2x2x1
jax: 0.10.0
libtpu: 0.0.40
codegen_flags: <defaults>
</compile_context>

<pallas_src>
import functools

import jax
import jax.numpy as jnp
from jax.experimental import pallas as pl
from jax.experimental.pallas import tpu as pltpu


def _astgcnn_kernel(x_ref, w_ref, bn_ref, gate_ref, pw_ref, filt_ref, fc_ref,
                    o_ref, *, bs, N, L, E, O, K, ksz):
    eps = 1e-5
    f32 = jnp.float32

    x_cm = x_ref[...]                                    # (bs, N, L) channel-major
    x_tm = jnp.transpose(x_cm, (0, 2, 1))                # (bs, L, N) time-major

    def conv_block(inp_tm, w_stk, dil, gamma, beta):
        # Conv1d(padding=(k-1)*dil, bias=False) + Chomp1d == causal conv.
        # All batches and all ksz taps fused into a single matmul.
        pad = (ksz - 1) * dil
        xpad = jnp.concatenate(
            [jnp.zeros((bs, pad, N), f32), inp_tm], axis=1)       # (bs, L+pad, N)
        taps = [xpad[:, tau * dil: tau * dil + L, :] for tau in range(ksz)]
        stacked = jnp.concatenate(taps, axis=-1).reshape(bs * L, ksz * N)
        y = jnp.dot(stacked, w_stk, preferred_element_type=f32)   # (bs*L, N)

        # Training-mode BatchNorm1d: biased per-channel stats over (batch, time),
        # normalize + affine folded into one scale/shift, then ReLU.
        mu = jnp.mean(y, axis=0, keepdims=True)                   # (1, N)
        yc = y - mu
        var = jnp.mean(yc * yc, axis=0, keepdims=True)            # biased var
        scale = jax.lax.rsqrt(var + eps) * gamma                  # (1, N)
        post = jnp.maximum(yc * scale + beta, 0.0)                # ReLU(BN(conv))

        # Residual path (downsample is None: in_ch == out_ch), outer ReLU.
        res = inp_tm.reshape(bs * L, N)
        return jnp.maximum(post + res, 0.0).reshape(bs, L, N)

    gamma1 = bn_ref[0:1, :]
    beta1 = bn_ref[1:2, :]
    gamma2 = bn_ref[2:3, :]
    beta2 = bn_ref[3:4, :]

    out0_tm = conv_block(x_tm, w_ref[0], 1, gamma1, beta1)        # (bs, L, N)
    out1_tm = conv_block(out0_tm, w_ref[1], 2, gamma2, beta2)     # (bs, L, N)
    tcn_cm = jnp.transpose(out1_tm, (0, 2, 1)).reshape(bs * N, L)  # (bs*N, L)

    # GatingMechanism: z = tanh(x @ theta_W^T + (theta_b + gate_bias)); z * tcn
    x_flat = x_cm.reshape(bs * N, L)
    thw = gate_ref[0:L, :]                                        # (L, E)
    thb = gate_ref[L:L + 1, :]                                    # (1, E)
    z = jnp.tanh(jnp.dot(x_flat, thw, preferred_element_type=f32) + thb)
    g_flat = z * tcn_cm                                           # requires E == L
    g = g_flat.reshape(bs, N, E)

    # construct_graph: adj = exp(-cdist(P g, P g))  (gram-matrix form of cdist)
    px = jnp.dot(g_flat, pw_ref[...],
                 preferred_element_type=f32).reshape(bs, N, E)
    sq = jnp.sum(px * px, axis=-1, keepdims=True)                 # (bs, N, 1)
    gram = jnp.einsum('bne,bme->bnm', px, px,
                      preferred_element_type=f32)                 # (bs, N, N)
    d2 = jnp.maximum(sq + jnp.transpose(sq, (0, 2, 1)) - 2.0 * gram, 0.0)
    adj = jnp.exp(-jnp.sqrt(d2))

    # ChebNet: sequential Chebyshev recurrence, filter applications fused into
    # one matmul against the stacked (K*E, O) filter bank.
    tx0 = g
    txs = [tx0]
    if K > 1:
        tx1 = jnp.einsum('bnm,bme->bne', adj, g, preferred_element_type=f32)
        txs.append(tx1)
        for _ in range(2, K):
            tx2 = 2.0 * jnp.einsum('bnm,bme->bne', adj, tx1,
                                   preferred_element_type=f32) - tx0
            txs.append(tx2)
            tx0, tx1 = tx1, tx2
    tx_all = jnp.concatenate(txs, axis=-1).reshape(bs * N, K * E)  # (bs*N, K*E)
    cheb = jnp.dot(tx_all, filt_ref[...],
                   preferred_element_type=f32)                     # (bs*N, O)

    # Node mean-pool + final FC, fully batched.
    pooled = jnp.mean(cheb.reshape(bs, N, O), axis=1)              # (bs, O)
    fcw = fc_ref[0:O, :]                                           # (O, 1)
    fcb = fc_ref[O:O + 1, :]                                       # (1, 1)
    o_ref[...] = jnp.dot(pooled, fcw, preferred_element_type=f32) + fcb


def init_params(key, N, L, E, O, K, ksz=6):
    ks = jax.random.split(key, 8)

    def rnd(k, shape, scale):
        return (scale * jax.random.normal(k, shape)).astype(jnp.float32)

    return dict(
        # conv_block1 / conv_block2 weights, stored as (k, out_ch, in_ch)
        w1=rnd(ks[0], (ksz, N, N), 0.1),
        w2=rnd(ks[1], (ksz, N, N), 0.1),
        # BatchNorm1d affine params (torch default init), shaped (1, N)
        bn1_g=jnp.ones((1, N), jnp.float32), bn1_b=jnp.zeros((1, N), jnp.float32),
        bn2_g=jnp.ones((1, N), jnp.float32), bn2_b=jnp.zeros((1, N), jnp.float32),
        # GatingMechanism: Linear(L -> E) weight (transposed) + its bias + extra bias
        theta_wT=rnd(ks[2], (L, E), 0.2),
        theta_b=rnd(ks[3], (1, E), 0.1),
        gate_bias=jnp.zeros((1, E), jnp.float32),
        # construct_graph: Linear(E -> E, bias=False) weight (transposed)
        p_wT=rnd(ks[4], (E, E), 0.2),
        # ChebNet filters (K, E, O)
        cheb=rnd(ks[5], (K, E, O), 0.3),
        # final fc: Linear(O -> 1)
        fc_wT=rnd(ks[6], (O, 1), 0.3),
        fc_b=rnd(ks[7], (1, 1), 0.1),
    )


def astgcnn_forward(X, params, *, E, O, K, ksz=6):
    bs, N, L = X.shape
    assert E == L, ("GatingMechanism broadcast (z * tcn_out) requires "
                    "encoder_out_dim == time_length")

    # --- One-time weight re-layout / packing in the XLA wrapper (free vs kernel).
    # Conv taps: (ksz, out, in) -> (ksz*in, out), both blocks packed into one op.
    w1_stk = jnp.transpose(params["w1"], (0, 2, 1)).reshape(ksz * N, N)
    w2_stk = jnp.transpose(params["w2"], (0, 2, 1)).reshape(ksz * N, N)
    w_pack = jnp.stack([w1_stk, w2_stk], axis=0)                   # (2, ksz*N, N)
    # Pack the four BN affine vectors into one (4, N) operand.
    bn_pack = jnp.concatenate([params["bn1_g"], params["bn1_b"],
                               params["bn2_g"], params["bn2_b"]], axis=0)
    # Gate: fold the extra gate bias into the Linear bias, pack with the weight.
    gate_pack = jnp.concatenate(
        [params["theta_wT"], params["theta_b"] + params["gate_bias"]], axis=0)
    # Stack the K Chebyshev filters into one (K*E, O) bank.
    cheb_stk = params["cheb"].reshape(K * E, O)
    # Pack the final FC weight and bias into one (O+1, 1) operand.
    fc_pack = jnp.concatenate([params["fc_wT"], params["fc_b"]], axis=0)

    kern = functools.partial(_astgcnn_kernel,
                             bs=bs, N=N, L=L, E=E, O=O, K=K, ksz=ksz)
    args = (X, w_pack, bn_pack, gate_pack, params["p_wT"], cheb_stk, fc_pack)
    vspec = pl.BlockSpec(memory_space=pltpu.MemorySpace.VMEM)
    return pl.pallas_call(
        kern,
        out_shape=jax.ShapeDtypeStruct((bs, 1), jnp.float32),
        in_specs=[vspec] * len(args),
        out_specs=vspec,
    )(*args)


if __name__ == "__main__":
    # bs=batch, N=num_nodes (conv channels), L=time_length, E=encoder_out_dim(==L),
    # O=output_dim, K=Chebyshev order
    bs, N, L = 2, 16, 8
    E, O, K = 8, 4, 3

    key = jax.random.PRNGKey(0)
    kx, kp = jax.random.split(key)
    X = jax.random.normal(kx, (bs, N, L), dtype=jnp.float32)
    params = init_params(kp, N, L, E, O, K)

    out = astgcnn_forward(X, params, E=E, O=O, K=K)
    out = jax.block_until_ready(out)
    assert out.shape == (bs, 1) and out.dtype == jnp.float32
    print("KERNEL_OK")
</pallas_src>

<mosaic_0001>
module attributes {stable_mosaic.version = 11 : i64} {
  func.func @_astgcnn_kernel(%arg0: memref<2x16x8xf32, #tpu.memory_space<vmem>>, %arg1: memref<2x96x16xf32, #tpu.memory_space<vmem>>, %arg2: memref<4x16xf32, #tpu.memory_space<vmem>>, %arg3: memref<9x8xf32, #tpu.memory_space<vmem>>, %arg4: memref<8x8xf32, #tpu.memory_space<vmem>>, %arg5: memref<24x4xf32, #tpu.memory_space<vmem>>, %arg6: memref<5x1xf32, #tpu.memory_space<vmem>>, %arg7: memref<2x1xf32, #tpu.memory_space<vmem>>) attributes {dimension_semantics = [], scalar_prefetch = 0 : i64, scratch_operands = 0 : i64, tpu.core_type = #tpu.core_type<tc>} {
    %c0 = arith.constant 0 : index
    %c0_0 = arith.constant 0 : index
    %c0_1 = arith.constant 0 : index
    %0 = vector.load %arg0[%c0, %c0_0, %c0_1] : memref<2x16x8xf32, #tpu.memory_space<vmem>>, vector<2x16x8xf32>
    %1 = tpu.transpose %0, [0, 2, 1] : vector<2x16x8xf32> -> vector<2x8x16xf32>
    %c0_2 = arith.constant 0 : index
    %c0_3 = arith.constant 0 : index
    %2 = vector.load %arg2[%c0_2, %c0_3] : memref<4x16xf32, #tpu.memory_space<vmem>>, vector<1x16xf32>
    %c1 = arith.constant 1 : index
    %c0_4 = arith.constant 0 : index
    %3 = vector.load %arg2[%c1, %c0_4] : memref<4x16xf32, #tpu.memory_space<vmem>>, vector<1x16xf32>
    %c2 = arith.constant 2 : index
    %c0_5 = arith.constant 0 : index
    %4 = vector.load %arg2[%c2, %c0_5] : memref<4x16xf32, #tpu.memory_space<vmem>>, vector<1x16xf32>
    %c3 = arith.constant 3 : index
    %c0_6 = arith.constant 0 : index
    %5 = vector.load %arg2[%c3, %c0_6] : memref<4x16xf32, #tpu.memory_space<vmem>>, vector<1x16xf32>
    %c0_7 = arith.constant 0 : index
    %c0_8 = arith.constant 0 : index
    %c0_9 = arith.constant 0 : index
    %6 = vector.load %arg1[%c0_7, %c0_8, %c0_9] : memref<2x96x16xf32, #tpu.memory_space<vmem>>, vector<1x96x16xf32>
    %7 = vector.shape_cast %6 : vector<1x96x16xf32> to vector<96x16xf32>
    %cst = arith.constant 0.000000e+00 : f32
    %8 = vector.broadcast %cst : f32 to vector<2x5x16xf32>
    %9 = tpu.concatenate %8, %1 in 1 : vector<2x5x16xf32>, vector<2x8x16xf32> -> vector<2x13x16xf32>
    %10 = vector.extract_strided_slice %9 {offsets = [0, 0, 0], sizes = [2, 8, 16], strides = [1, 1, 1]} : vector<2x13x16xf32> to vector<2x8x16xf32>
    %11 = vector.extract_strided_slice %9 {offsets = [0, 1, 0], sizes = [2, 8, 16], strides = [1, 1, 1]} : vector<2x13x16xf32> to vector<2x8x16xf32>
    %12 = vector.extract_strided_slice %9 {offsets = [0, 2, 0], sizes = [2, 8, 16], strides = [1, 1, 1]} : vector<2x13x16xf32> to vector<2x8x16xf32>
    %13 = vector.extract_strided_slice %9 {offsets = [0, 3, 0], sizes = [2, 8, 16], strides = [1, 1, 1]} : vector<2x13x16xf32> to vector<2x8x16xf32>
    %14 = vector.extract_strided_slice %9 {offsets = [0, 4, 0], sizes = [2, 8, 16], strides = [1, 1, 1]} : vector<2x13x16xf32> to vector<2x8x16xf32>
    %15 = vector.extract_strided_slice %9 {offsets = [0, 5, 0], sizes = [2, 8, 16], strides = [1, 1, 1]} : vector<2x13x16xf32> to vector<2x8x16xf32>
    %16 = tpu.concatenate %10, %11, %12, %13, %14, %15 in 2 : vector<2x8x16xf32>, vector<2x8x16xf32>, vector<2x8x16xf32>, vector<2x8x16xf32>, vector<2x8x16xf32>, vector<2x8x16xf32> -> vector<2x8x96xf32>
    %17 = vector.shape_cast %16 : vector<2x8x96xf32> to vector<16x96xf32>
    %cst_10 = arith.constant dense<0.000000e+00> : vector<16x16xf32>
    %18 = tpu.matmul %17, %7, %cst_10 {dimension_numbers = #tpu.dot_dimension_numbers<[1], [0], [0], [1], [0, 0, 1, 1], [], []>} : vector<16x96xf32>, vector<96x16xf32>, vector<16x16xf32> -> vector<16x16xf32>
    %cst_11 = arith.constant dense<0.000000e+00> : vector<16xf32>
    %19 = vector.multi_reduction <add>, %18, %cst_11 [0] : vector<16x16xf32> to vector<16xf32>
    %20 = vector.shape_cast %19 : vector<16xf32> to vector<1x16xf32>
    %cst_12 = arith.constant 1.600000e+01 : f32
    %21 = vector.broadcast %cst_12 : f32 to vector<1x16xf32>
    %22 = arith.divf %20, %21 : vector<1x16xf32>
    %23 = vector.broadcast %22 : vector<1x16xf32> to vector<16x16xf32>
    %24 = arith.subf %18, %23 : vector<16x16xf32>
    %25 = arith.mulf %24, %24 : vector<16x16xf32>
    %cst_13 = arith.constant dense<0.000000e+00> : vector<16xf32>
    %26 = vector.multi_reduction <add>, %25, %cst_13 [0] : vector<16x16xf32> to vector<16xf32>
    %27 = vector.shape_cast %26 : vector<16xf32> to vector<1x16xf32>
    %cst_14 = arith.constant 1.600000e+01 : f32
    %28 = vector.broadcast %cst_14 : f32 to vector<1x16xf32>
    %29 = arith.divf %27, %28 : vector<1x16xf32>
    %cst_15 = arith.constant 9.99999974E-6 : f32
    %30 = vector.broadcast %cst_15 : f32 to vector<1x16xf32>
    %31 = arith.addf %29, %30 : vector<1x16xf32>
    %32 = math.rsqrt %31 : vector<1x16xf32>
    %33 = arith.mulf %32, %2 : vector<1x16xf32>
    %34 = vector.broadcast %33 : vector<1x16xf32> to vector<16x16xf32>
    %35 = arith.mulf %24, %34 : vector<16x16xf32>
    %36 = vector.broadcast %3 : vector<1x16xf32> to vector<16x16xf32>
    %37 = arith.addf %35, %36 : vector<16x16xf32>
    %cst_16 = arith.constant 0.000000e+00 : f32
    %38 = vector.broadcast %cst_16 : f32 to vector<16x16xf32>
    %39 = arith.maximumf %37, %38 : vector<16x16xf32>
    %40 = vector.shape_cast %1 : vector<2x8x16xf32> to vector<16x16xf32>
    %41 = arith.addf %39, %40 : vector<16x16xf32>
    %cst_17 = arith.constant 0.000000e+00 : f32
    %42 = vector.broadcast %cst_17 : f32 to vector<16x16xf32>
    %43 = arith.maximumf %41, %42 : vector<16x16xf32>
    %44 = vector.shape_cast %43 : vector<16x16xf32> to vector<2x8x16xf32>
    %c1_18 = arith.constant 1 : index
    %c0_19 = arith.constant 0 : index
    %c0_20 = arith.constant 0 : index
    %45 = vector.load %arg1[%c1_18, %c0_19, %c0_20] : memref<2x96x16xf32, #tpu.memory_space<vmem>>, vector<1x96x16xf32>
    %46 = vector.shape_cast %45 : vector<1x96x16xf32> to vector<96x16xf32>
    %cst_21 = arith.constant 0.000000e+00 : f32
    %47 = vector.broadcast %cst_21 : f32 to vector<2x10x16xf32>
    %48 = tpu.concatenate %47, %44 in 1 : vector<2x10x16xf32>, vector<2x8x16xf32> -> vector<2x18x16xf32>
    %49 = vector.extract_strided_slice %48 {offsets = [0, 0, 0], sizes = [2, 8, 16], strides = [1, 1, 1]} : vector<2x18x16xf32> to vector<2x8x16xf32>
    %50 = vector.extract_strided_slice %48 {offsets = [0, 2, 0], sizes = [2, 8, 16], strides = [1, 1, 1]} : vector<2x18x16xf32> to vector<2x8x16xf32>
    %51 = vector.extract_strided_slice %48 {offsets = [0, 4, 0], sizes = [2, 8, 16], strides = [1, 1, 1]} : vector<2x18x16xf32> to vector<2x8x16xf32>
    %52 = vector.extract_strided_slice %48 {offsets = [0, 6, 0], sizes = [2, 8, 16], strides = [1, 1, 1]} : vector<2x18x16xf32> to vector<2x8x16xf32>
    %53 = vector.extract_strided_slice %48 {offsets = [0, 8, 0], sizes = [2, 8, 16], strides = [1, 1, 1]} : vector<2x18x16xf32> to vector<2x8x16xf32>
    %54 = vector.extract_strided_slice %48 {offsets = [0, 10, 0], sizes = [2, 8, 16], strides = [1, 1, 1]} : vector<2x18x16xf32> to vector<2x8x16xf32>
    %55 = tpu.concatenate %49, %50, %51, %52, %53, %54 in 2 : vector<2x8x16xf32>, vector<2x8x16xf32>, vector<2x8x16xf32>, vector<2x8x16xf32>, vector<2x8x16xf32>, vector<2x8x16xf32> -> vector<2x8x96xf32>
    %56 = vector.shape_cast %55 : vector<2x8x96xf32> to vector<16x96xf32>
    %cst_22 = arith.constant dense<0.000000e+00> : vector<16x16xf32>
    %57 = tpu.matmul %56, %46, %cst_22 {dimension_numbers = #tpu.dot_dimension_numbers<[1], [0], [0], [1], [0, 0, 1, 1], [], []>} : vector<16x96xf32>, vector<96x16xf32>, vector<16x16xf32> -> vector<16x16xf32>
    %cst_23 = arith.constant dense<0.000000e+00> : vector<16xf32>
    %58 = vector.multi_reduction <add>, %57, %cst_23 [0] : vector<16x16xf32> to vector<16xf32>
    %59 = vector.shape_cast %58 : vector<16xf32> to vector<1x16xf32>
    %cst_24 = arith.constant 1.600000e+01 : f32
    %60 = vector.broadcast %cst_24 : f32 to vector<1x16xf32>
    %61 = arith.divf %59, %60 : vector<1x16xf32>
    %62 = vector.broadcast %61 : vector<1x16xf32> to vector<16x16xf32>
    %63 = arith.subf %57, %62 : vector<16x16xf32>
    %64 = arith.mulf %63, %63 : vector<16x16xf32>
    %cst_25 = arith.constant dense<0.000000e+00> : vector<16xf32>
    %65 = vector.multi_reduction <add>, %64, %cst_25 [0] : vector<16x16xf32> to vector<16xf32>
    %66 = vector.shape_cast %65 : vector<16xf32> to vector<1x16xf32>
    %cst_26 = arith.constant 1.600000e+01 : f32
    %67 = vector.broadcast %cst_26 : f32 to vector<1x16xf32>
    %68 = arith.divf %66, %67 : vector<1x16xf32>
    %cst_27 = arith.constant 9.99999974E-6 : f32
    %69 = vector.broadcast %cst_27 : f32 to vector<1x16xf32>
    %70 = arith.addf %68, %69 : vector<1x16xf32>
    %71 = math.rsqrt %70 : vector<1x16xf32>
    %72 = arith.mulf %71, %4 : vector<1x16xf32>
    %73 = vector.broadcast %72 : vector<1x16xf32> to vector<16x16xf32>
    %74 = arith.mulf %63, %73 : vector<16x16xf32>
    %75 = vector.broadcast %5 : vector<1x16xf32> to vector<16x16xf32>
    %76 = arith.addf %74, %75 : vector<16x16xf32>
    %cst_28 = arith.constant 0.000000e+00 : f32
    %77 = vector.broadcast %cst_28 : f32 to vector<16x16xf32>
    %78 = arith.maximumf %76, %77 : vector<16x16xf32>
    %79 = vector.shape_cast %44 : vector<2x8x16xf32> to vector<16x16xf32>
    %80 = arith.addf %78, %79 : vector<16x16xf32>
    %cst_29 = arith.constant 0.000000e+00 : f32
    %81 = vector.broadcast %cst_29 : f32 to vector<16x16xf32>
    %82 = arith.maximumf %80, %81 : vector<16x16xf32>
    %83 = vector.shape_cast %82 : vector<16x16xf32> to vector<2x8x16xf32>
    %84 = tpu.transpose %83, [0, 2, 1] : vector<2x8x16xf32> -> vector<2x16x8xf32>
    %85 = vector.shape_cast %84 : vector<2x16x8xf32> to vector<32x8xf32>
    %86 = vector.shape_cast %0 : vector<2x16x8xf32> to vector<32x8xf32>
    %c0_30 = arith.constant 0 : index
    %c0_31 = arith.constant 0 : index
    %87 = vector.load %arg3[%c0_30, %c0_31] : memref<9x8xf32, #tpu.memory_space<vmem>>, vector<8x8xf32>
    %c8 = arith.constant 8 : index
    %c0_32 = arith.constant 0 : index
    %88 = vector.load %arg3[%c8, %c0_32] : memref<9x8xf32, #tpu.memory_space<vmem>>, vector<1x8xf32>
    %cst_33 = arith.constant dense<0.000000e+00> : vector<32x8xf32>
    %89 = tpu.matmul %86, %87, %cst_33 {dimension_numbers = #tpu.dot_dimension_numbers<[1], [0], [0], [1], [0, 0, 1, 1], [], []>} : vector<32x8xf32>, vector<8x8xf32>, vector<32x8xf32> -> vector<32x8xf32>
    %90 = vector.broadcast %88 : vector<1x8xf32> to vector<32x8xf32>
    %91 = arith.addf %89, %90 : vector<32x8xf32>
    %92 = math.tanh %91 : vector<32x8xf32>
    %93 = arith.mulf %92, %85 : vector<32x8xf32>
    %94 = vector.shape_cast %93 : vector<32x8xf32> to vector<2x16x8xf32>
    %c0_34 = arith.constant 0 : index
    %c0_35 = arith.constant 0 : index
    %95 = vector.load %arg4[%c0_34, %c0_35] : memref<8x8xf32, #tpu.memory_space<vmem>>, vector<8x8xf32>
    %cst_36 = arith.constant dense<0.000000e+00> : vector<32x8xf32>
    %96 = tpu.matmul %93, %95, %cst_36 {dimension_numbers = #tpu.dot_dimension_numbers<[1], [0], [0], [1], [0, 0, 1, 1], [], []>} : vector<32x8xf32>, vector<8x8xf32>, vector<32x8xf32> -> vector<32x8xf32>
    %97 = vector.shape_cast %96 : vector<32x8xf32> to vector<2x16x8xf32>
    %98 = arith.mulf %97, %97 : vector<2x16x8xf32>
    %cst_37 = arith.constant dense<0.000000e+00> : vector<2x16xf32>
    %99 = vector.multi_reduction <add>, %98, %cst_37 [2] : vector<2x16x8xf32> to vector<2x16xf32>
    %100 = vector.shape_cast %99 : vector<2x16xf32> to vector<2x16x1xf32>
    "tpu.trace_start"() <{level = 10 : i32, message = "bne,bme->bnm"}> : () -> ()
    %cst_38 = arith.constant dense<0.000000e+00> : vector<2x16x16xf32>
    %101 = tpu.matmul %97, %97, %cst_38 {dimension_numbers = #tpu.dot_dimension_numbers<[2], [2], [1], [1], [0, 0, 0, 1, 1, 1], [0], [0]>} : vector<2x16x8xf32>, vector<2x16x8xf32>, vector<2x16x16xf32> -> vector<2x16x16xf32>
    "tpu.trace_stop"() : () -> ()
    %102 = tpu.transpose %100, [0, 2, 1] : vector<2x16x1xf32> -> vector<2x1x16xf32>
    %103 = vector.broadcast %100 : vector<2x16x1xf32> to vector<2x16x16xf32>
    %104 = vector.broadcast %102 : vector<2x1x16xf32> to vector<2x16x16xf32>
    %105 = arith.addf %103, %104 : vector<2x16x16xf32>
    %cst_39 = arith.constant 2.000000e+00 : f32
    %106 = vector.broadcast %cst_39 : f32 to vector<2x16x16xf32>
    %107 = arith.mulf %106, %101 : vector<2x16x16xf32>
    %108 = arith.subf %105, %107 : vector<2x16x16xf32>
    %cst_40 = arith.constant 0.000000e+00 : f32
    %109 = vector.broadcast %cst_40 : f32 to vector<2x16x16xf32>
    %110 = arith.maximumf %108, %109 : vector<2x16x16xf32>
    %111 = math.sqrt %110 : vector<2x16x16xf32>
    %cst_41 = arith.constant 0.000000e+00 : f32
    %112 = vector.broadcast %cst_41 : f32 to vector<2x16x16xf32>
    %113 = arith.subf %112, %111 : vector<2x16x16xf32>
    %114 = math.exp %113 : vector<2x16x16xf32>
    "tpu.trace_start"() <{level = 10 : i32, message = "bnm,bme->bne"}> : () -> ()
    %cst_42 = arith.constant dense<0.000000e+00> : vector<2x16x8xf32>
    %115 = tpu.matmul %114, %94, %cst_42 {dimension_numbers = #tpu.dot_dimension_numbers<[2], [1], [1], [2], [0, 0, 0, 1, 1, 2], [0], [0]>} : vector<2x16x16xf32>, vector<2x16x8xf32>, vector<2x16x8xf32> -> vector<2x16x8xf32>
    %cst_43 = arith.constant dense<0.000000e+00> : vector<2x16x8xf32>
    %116 = tpu.matmul %114, %115, %cst_43 {dimension_numbers = #tpu.dot_dimension_numbers<[2], [1], [1], [2], [0, 0, 0, 1, 1, 2], [0], [0]>} : vector<2x16x16xf32>, vector<2x16x8xf32>, vector<2x16x8xf32> -> vector<2x16x8xf32>
    "tpu.trace_stop"() : () -> ()
    %cst_44 = arith.constant 2.000000e+00 : f32
    %117 = vector.broadcast %cst_44 : f32 to vector<2x16x8xf32>
    %118 = arith.mulf %117, %116 : vector<2x16x8xf32>
    %119 = arith.subf %118, %94 : vector<2x16x8xf32>
    %120 = tpu.concatenate %94, %115, %119 in 2 : vector<2x16x8xf32>, vector<2x16x8xf32>, vector<2x16x8xf32> -> vector<2x16x24xf32>
    %121 = vector.shape_cast %120 : vector<2x16x24xf32> to vector<32x24xf32>
    %c0_45 = arith.constant 0 : index
    %c0_46 = arith.constant 0 : index
    %122 = vector.load %arg5[%c0_45, %c0_46] : memref<24x4xf32, #tpu.memory_space<vmem>>, vector<24x4xf32>
    %cst_47 = arith.constant dense<0.000000e+00> : vector<32x4xf32>
    %123 = tpu.matmul %121, %122, %cst_47 {dimension_numbers = #tpu.dot_dimension_numbers<[1], [0], [0], [1], [0, 0, 1, 1], [], []>} : vector<32x24xf32>, vector<24x4xf32>, vector<32x4xf32> -> vector<32x4xf32>
    %124 = vector.shape_cast %123 : vector<32x4xf32> to vector<2x16x4xf32>
    %cst_48 = arith.constant dense<0.000000e+00> : vector<2x4xf32>
    %125 = vector.multi_reduction <add>, %124, %cst_48 [1] : vector<2x16x4xf32> to vector<2x4xf32>
    %cst_49 = arith.constant 1.600000e+01 : f32
    %126 = vector.broadcast %cst_49 : f32 to vector<2x4xf32>
    %127 = arith.divf %125, %126 : vector<2x4xf32>
    %c0_50 = arith.constant 0 : index
    %c0_51 = arith.constant 0 : index
    %128 = vector.load %arg6[%c0_50, %c0_51] : memref<5x1xf32, #tpu.memory_space<vmem>>, vector<4x1xf32>
    %c4 = arith.constant 4 : index
    %c0_52 = arith.constant 0 : index
    %129 = vector.load %arg6[%c4, %c0_52] : memref<5x1xf32, #tpu.memory_space<vmem>>, vector<1x1xf32>
    %cst_53 = arith.constant dense<0.000000e+00> : vector<2x1xf32>
    %130 = tpu.matmul %127, %128, %cst_53 {dimension_numbers = #tpu.dot_dimension_numbers<[1], [0], [0], [1], [0, 0, 1, 1], [], []>} : vector<2x4xf32>, vector<4x1xf32>, vector<2x1xf32> -> vector<2x1xf32>
    %131 = vector.broadcast %129 : vector<1x1xf32> to vector<2x1xf32>
    %132 = arith.addf %130, %131 : vector<2x1xf32>
    %c0_54 = arith.constant 0 : index
    %c0_55 = arith.constant 0 : index
    %133 = vector.load %arg7[%c0_54, %c0_55] : memref<2x1xf32, #tpu.memory_space<vmem>>, vector<2x1xf32>
    tpu.vector_store %arg7[%c0_54, %c0_55], %132 {strides = array<i32>} : memref<2x1xf32, #tpu.memory_space<vmem>>, vector<2x1xf32>,
    return
  }
}

</mosaic_0001>

<bundles_post_ra>
// kernel: tpu_custom_call.1
= control target key start
LH: loop header
LB: loop body
LE: loop exit
PB: predicated region body
PF: predicated region fallthrough
CT: control target
= control target key end

     0   :  { %vm116_vm0 = vcmask 1044480   ;;  %vm121_vm1 = vcmask 1046528   ;;  %s2057_s20 = smov 16   ;;  %vm134_vm2 = vcmask 1045504   ;;  %s2058_s29 = smov 32   ;;  %vm159_vm3 = vcmask 1043456   ;;  %s2455_s0 = inlined_call_operand.vmem [shape: f32[2,16,8], index: 0, kind: input, shape index: {}]   ;;  %s2456_s1 = inlined_call_operand.vmem [shape: f32[2,96,16], index: 1, kind: input, shape index: {}]   ;;  %s2457_s2 = inlined_call_operand.vmem [shape: f32[4,16], index: 2, kind: input, shape index: {}]   ;;  %s2458_s3 = inlined_call_operand.vmem [shape: f32[9,8], index: 3, kind: input, shape index: {}]   ;;  %s2459_s4 = inlined_call_operand.vmem [shape: f32[8,8], index: 4, kind: input, shape index: {}]   ;;  %s2460_s5 = inlined_call_operand.vmem [shape: f32[24,4], index: 5, kind: input, shape index: {}]   ;;  %s2461_s6 = inlined_call_operand.vmem [shape: f32[5,1], index: 6, kind: input, shape index: {}]   ;;  %s2462_s7 = inlined_call_operand.vmem [shape: f32[2,1], index: 7, kind: output, shape index: {}]  }
   0x1   :  { %v2108_v0 = vld [vmem:[%s2455_s0 + $0x10] sm:$0xff]  ;;  %v2113_v1 = vld [vmem:[%s2455_s0] sm:$0xff]  ;;  %v2120_v2 = vld [vmem:[%s2455_s0 + $0x18] sm:$0xff]  ;;  %s2059_s30 = smov 48   ;;  %s2060_s12 = smov 64   ;;  %vm172_vm4 = vcmask 1042432  }
   0x2   :  { %62 = vxpose.xlu1.b32.start [1/2] (short) (narrow) %v2108_v0, 8  ;;  %30 = vxpose.xlu0.b32.start [1/2] (short) (narrow) %v2113_v1, 8  ;;  %v2125_v3 = vld [vmem:[%s2455_s0 + $0x8] sm:$0xff]  ;;  %v98_v4 = vld [vmem:[%s2456_s1] sm:$0xff]  ;;  %v100_v7 = vld [vmem:[%s2456_s1 + $0x10] sm:$0xff]  ;;  %s2061_s13 = smov 80  }
   0x3   :  { %v99_v5 = vld [vmem:[%s2456_s1 + $0x8] sm:$0xff]  ;;  %v101_v8 = vld [vmem:[%s2456_s1 + $0x18] sm:$0xff]  ;;  %v102_v10 = vld [vmem:[%s2456_s1 + $0x20] sm:$0xff]  ;;  %vm185_vm5 = vcmask 130048   ;;  %vm188_vm6 = vcmask 261120   ;;  %vm191_vm7 = vcmask 392192  }
   0x4   :  { %v1941_v6 = vpack.c.bf16 %v99_v5, %v98_v4  ;;  %v1945_v9 = vpack.c.bf16 %v101_v8, %v100_v7  ;;  %v103_v11 = vld [vmem:[%s2456_s1 + $0x28] sm:$0xff]  ;;  %v104_v29 = vld [vmem:[%s2456_s1 + $0x30] sm:$0xff]  ;;  %v105_v30 = vld [vmem:[%s2456_s1 + $0x38] sm:$0xff]  ;;  %vm194_vm8 = vcmask 523264   ;;  %vm197_vm9 = vcmask 654336  }
   0x5   :  { %v1949_v12 = vpack.c.bf16 %v103_v11, %v102_v10  ;;  %v106_v32 = vld [vmem:[%s2456_s1 + $0x40] sm:$0xff]  ;;  %v107_v33 = vld [vmem:[%s2456_s1 + $0x48] sm:$0xff]  ;;  %v1953_v39 = vpack.c.bf16 %v105_v30, %v104_v29  ;;  %v108_v41 = vld [vmem:[%s2456_s1 + $0x50] sm:$0xff]  ;;  %vm200_vm10 = vcmask 785408   ;;  %vm347_vm11 = vcmask 1041408  }
   0x6   :  { %63 = vxpose.xlu1.b32.end [2/2] (short) (narrow) %v2120_v2, 8  ;;  %31 = vxpose.xlu0.b32.end [2/2] (short) (narrow) %v2125_v3, 8  ;;  %v1957_v40 = vpack.c.bf16 %v107_v33, %v106_v32  ;;  %v109_v42 = vld [vmem:[%s2456_s1 + $0x58] sm:$0xff]  ;;  %vm608_vm12 = vcmask 64512  }
   0x7   :  { %1942 = vmatprep.subr.bf16.mxu0 %v1941_v6  ;;  %v1961_v49 = vpack.c.bf16 %v109_v42, %v108_v41  ;;  %vm2371_vm13 = vmpackc.low %vm608_vm12, %vm608_vm12 }
   0x8   :  { %1944 = vmatpush3.bf16.msra.mxu0 %v1941_v6 }
   0x9   :  { %1946 = vmatprep.subr.bf16.mxu0 %v1945_v9 }
   0xc   :  { %1948 = vmatpush3.bf16.msra.mxu0 %v1945_v9 }
   0xd   :  { %1950 = vmatprep.subr.bf16.mxu0 %v1949_v12 }
  0x10   :  { %1952 = vmatpush3.bf16.msra.mxu0 %v1949_v12 }
  0x11   :  { %1954 = vmatprep.subr.bf16.mxu0 %v1953_v39 }
  0x14   :  { %1956 = vmatpush3.bf16.msra.mxu0 %v1953_v39 }
  0x15   :  { %1958 = vmatprep.subr.bf16.mxu0 %v1957_v40 }
  0x18   :  { %1960 = vmatpush3.bf16.msra.mxu0 %v1957_v40 }
  0x19   :  { %1962 = vmatprep.subr.bf16.mxu0 %v1961_v49 }
  0x1c   :  { %1964 = vmatpush3.bf16.msra.mxu0 %v1961_v49 }
  0x82   :  { %v2147_v13 = vpop.trf.xlu1  ;;  %v2149_v14 = vpop.trf.xlu0 }
  0x83   :  { %v113_v15 = vrot.slane %v2147_v13, 3  ;;  %v2153_v16 = vrot.slane %v2149_v14, 3 }
  0x85   :  { %v2156_v17 = vsel %vm116_vm0, 0.0, %v113_v15  ;;  %v126_v18 = vrot.slane %v113_v15, 1  ;;  %v2160_v19 = vsel %vm116_vm0, 0.0, %v2153_v16  ;;  %v123_v20 = vrot.slane %v2153_v16, 1 }
  0x86   :  { %v125_v21 = vrot.slane %v2156_v17, 1  ;;  %v122_v22 = vrot.slane %v2160_v19, 1  ;;  %v135_v23 = vrot.slane %v2160_v19, 2  ;;  %v136_v24 = vrot.slane %v2153_v16, 2 }
  0x87   :  { %v150_v27 = vrot.slane %v2156_v17, 3  ;;  %v151_v28 = vrot.slane %v113_v15, 3  ;;  %v138_v34 = vrot.slane %v2156_v17, 2  ;;  %v139_v35 = vrot.slane %v113_v15, 2 }
  0x88   :  { %v127_v25 = vsel %vm121_vm1, %v125_v21, %v126_v18  ;;  %v124_v26 = vsel %vm121_vm1, %v122_v22, %v123_v20  ;;  %v137_v31 = vsel %vm134_vm2, %v135_v23, %v136_v24  ;;  %v163_v37 = vrot.slane %v2156_v17, 4  ;;  %v1695_v21 = vld [vmem:[%s2456_s1 + $0x68] sm:$0xff]  ;;  %v1696_v22 = vld [vmem:[%s2456_s1 + $0x70] sm:$0xff]  ;;  %v1697_v24 = vld [vmem:[%s2456_s1 + $0x78] sm:$0xff] }
  0x89   :  { %130 = vrot.lane.b32.xlu1 %v127_v25, %s2057_s20  ;;  %128 = vrot.lane.b32.xlu0 %v124_v26, %s2057_s20  ;;  %v152_v36 = vsel %vm116_vm0, %v150_v27, %v151_v28  ;;  %v164_v38 = vrot.slane %v113_v15, 4  ;;  %v140_v43 = vsel %vm134_vm2, %v138_v34, %v139_v35  ;;  %v147_v44 = vrot.slane %v2160_v19, 3 }
  0x8a   :  { %v148_v45 = vrot.slane %v2153_v16, 3  ;;  %v176_v47 = vrot.slane %v2156_v17, 5  ;;  %v177_v48 = vrot.slane %v113_v15, 5  ;;  %v160_v52 = vrot.slane %v2160_v19, 4 }
  0x8b   :  { %v165_v46 = vsel %vm159_vm3, %v163_v37, %v164_v38  ;;  %v161_v53 = vrot.slane %v2153_v16, 4  ;;  %v173_v55 = vrot.slane %v2160_v19, 5  ;;  %v174_v56 = vrot.slane %v2153_v16, 5 }
  0x8c   :  { %v149_v50 = vsel %vm116_vm0, %v147_v44, %v148_v45  ;;  %v178_v51 = vsel %vm172_vm4, %v176_v47, %v177_v48  ;;  %v1969_v25 = vpack.c.bf16 %v1697_v24, %v1696_v22  ;;  %v2062_v22 = vmov 0.0  }
  0x8d   :  { %141 = vrot.lane.b32.xlu1 %v137_v31, %s2058_s29  ;;  %155 = vrot.lane.b32.xlu0 %v152_v36, %s2059_s30  ;;  %v162_v54 = vsel %vm159_vm3, %v160_v52, %v161_v53  ;;  %v175_v57 = vsel %vm172_vm4, %v173_v55, %v174_v56  ;;  %v310_v53 = vlaneseq  ;;  %v94_v55 = vld [vmem:[%s2457_s2] sm:$0x1] }
  0x91   :  { %143 = vrot.lane.b32.xlu1 %v140_v43, %s2058_s29  ;;  %168 = vrot.lane.b32.xlu0 %v165_v46, %s2060_s12 }
  0x95   :  { %153 = vrot.lane.b32.xlu1 %v149_v50, %s2059_s30  ;;  %181 = vrot.lane.b32.xlu0 %v178_v51, %s2061_s13 }
  0x99   :  { %166 = vrot.lane.b32.xlu1 %v162_v54, %s2060_s12  ;;  %v311_v54 = vshrl.u32 %v310_v53, 7 }
  0x9b   :  { %v2244_v56 = vsub.s32 0, %v311_v54 }
  0x9d   :  { %179 = vrot.lane.b32.xlu1 %v175_v57, %s2061_s13 }
  0xfb   :  { %v131_v58 = vpop.permute.xlu1 %130  ;;  %v129_v59 = vpop.permute.xlu0 %128 }
  0xfc   :  { %v187_v63 = vsel %vm185_vm5, %v2156_v17, %v131_v58  ;;  %v186_v9 = vsel %vm185_vm5, %v2160_v19, %v129_v59  ;;  %v1694_v19 = vld [vmem:[%s2456_s1 + $0x60] sm:$0xff] }
  0xfd   :  { %v1965_v23 = vpack.c.bf16 %v1695_v21, %v1694_v19  ;;  %v1703_v19 = vld [vmem:[%s2456_s1 + $0xa8] sm:$0xff] }
  0xff   :  { %v142_v60 = vpop.permute.xlu1 %141  ;;  %v156_v61 = vpop.permute.xlu0 %155  ;;  %1966 = vmatprep.subr.bf16.mxu1 %v1965_v23 }
 0x100   :  { %v189_v10 = vsel %vm188_vm6, %v186_v9, %v142_v60  ;;  %1968 = vmatpush3.bf16.msra.mxu1 %v1965_v23  ;;  %v1693_v60 = vld [vmem:[%s2457_s2 + $0x1] ss:$0 sm:$0xff]  ;;  %v353_v23 = vrot.slane %v2062_v22, 2 }
 0x101   :  { %1970 = vmatprep.subr.bf16.mxu1 %v1969_v25 }
 0x103   :  { %v144_v62 = vpop.permute.xlu1 %143  ;;  %v169_v6 = vpop.permute.xlu0 %168 }
 0x104   :  { %v190_v5 = vsel %vm188_vm6, %v187_v63, %v144_v62  ;;  %1972 = vmatpush3.bf16.msra.mxu1 %v1969_v25  ;;  %v1699_v62 = vld [vmem:[%s2456_s1 + $0x88] sm:$0xff] }
 0x105   :  { %v193_v7 = vsel %vm191_vm7, %v190_v5, %v156_v61  ;;  %v1698_v61 = vld [vmem:[%s2456_s1 + $0x80] sm:$0xff] }
 0x106   :  { %v196_v11 = vsel %vm194_vm8, %v193_v7, %v169_v6  ;;  %v1973_v5 = vpack.c.bf16 %v1699_v62, %v1698_v61 }
 0x107   :  { %v154_v4 = vpop.permute.xlu1 %153  ;;  %v182_v15 = vpop.permute.xlu0 %181 }
 0x108   :  { %v192_v12 = vsel %vm191_vm7, %v189_v10, %v154_v4  ;;  %v199_v20 = vsel %vm197_vm9, %v196_v11, %v182_v15  ;;  %1974 = vmatprep.subr.bf16.mxu1 %v1973_v5  ;;  %v1700_v10 = vld [vmem:[%s2456_s1 + $0x90] sm:$0xff]  ;;  %v1701_v11 = vld [vmem:[%s2456_s1 + $0x98] sm:$0xff] }
 0x109   :  { %1976 = vmatpush3.bf16.msra.mxu1 %v1973_v5  ;;  %v1709_v5 = vld [vmem:[%s2458_s3 + $0x8] ss:$0 sm:$0xff] }
 0x10b   :  { %v167_v8 = vpop.permute.xlu1 %166 }
 0x10c   :  { %v195_v16 = vsel %vm194_vm8, %v192_v12, %v167_v8  ;;  %v1977_v12 = vpack.c.bf16 %v1701_v11, %v1700_v10 }
 0x10e   :  { %1978 = vmatprep.subr.bf16.mxu1 %v1977_v12 }
 0x10f   :  { %v180_v17 = vpop.permute.xlu1 %179  ;;  %1980 = vmatpush3.bf16.msra.mxu1 %v1977_v12 }
 0x110   :  { %v198_v18 = vsel %vm197_vm9, %v195_v16, %v180_v17 }
 0x111   :  { %1836 = vmatprep.mubr.msk.f32.mxu0 %vm200_vm10, %v198_v18 }
 0x112   :  { %1837 = vmatmul.mubr.msk.f32.vlgmr.msra.gmra.mrb[0].mxu0 %vm200_vm10, %v199_v20  ;;  %v1702_v20 = vld [vmem:[%s2456_s1 + $0xa0] sm:$0xff] }
 0x113   :  { %1868 = vmatprep.mubr.msk.f32.mxu0 %vm608_vm12, %v2113_v1 }
 0x1e5   :  { %v1838_v26 = vpop.f32.mrb[0].mxu0 }
 0x1e6   :  { %v283_v27 = vsel %vm185_vm5, %v1838_v26, 0.0  ;;  %v273_v28 = vpop.f32.mrb[1].mxu0 }
 0x1e7   :  { %v282_v29 = vsel %vm185_vm5, %v273_v28, 0.0 }
 0x1e8   :  { %v284_v30 = vadd.f32 %v283_v27, %v282_v29  ;;  %v1705_v27 = vld [vmem:[%s2456_s1 + $0xb8] sm:$0xff] }
 0x1ea   :  { %v285_v31 = vrot.slane %v284_v30, 4 }
 0x1ec   :  { %v286_v32 = vadd.f32 %v285_v31, %v284_v30 }
 0x1ee   :  { %v287_v33 = vrot.slane %v286_v32, 2 }
 0x1f0   :  { %v288_v34 = vadd.f32 %v287_v33, %v286_v32  ;;  %v364_v33 = vrot.slane %v2062_v22, 4 }
 0x1f2   :  { %v289_v35 = vrot.slane %v288_v34, 1 }
 0x1f4   :  { %v290_v36 = vadd.f32 %v289_v35, %v288_v34 }
 0x1f6   :  { %v292_v37 = vmul.f32 0.0625, %v290_v36  ;;  %v375_v36 = vrot.slane %v2062_v22, 6 }
 0x1f8   :  { %v293_v38 = vsub.f32 %v273_v28, %v292_v37  ;;  %v294_v39 = vsub.f32 %v1838_v26, %v292_v37  ;;  %v1704_v26 = vld [vmem:[%s2456_s1 + $0xb0] sm:$0xff]  ;;  %v602_v37 = vld [vmem:[%s2458_s3] sm:$0xff] }
 0x1f9   :  { %v1985_v30 = vpack.c.bf16 %v1705_v27, %v1704_v26  ;;  %1866 = vmatprep.subr.mxu0 %v602_v37 }
 0x1fa   :  { %v295_v40 = vmul.f32 %v293_v38, %v293_v38  ;;  %v296_v41 = vmul.f32 %v294_v39, %v294_v39  ;;  %1867 = vmatpush3.msra.mxu0 %v602_v37 }
 0x1fb   :  { %1869 = vmatmul.mubr.msk.f32.vlgmr.msra.gmra.mrb[2].mxu0 %vm608_vm12, %v2125_v3 }
 0x1fc   :  { %v297_v42 = vsel %vm185_vm5, %v295_v40, 0.0  ;;  %v298_v43 = vsel %vm185_vm5, %v296_v41, 0.0  ;;  %1871 = vmatprep.mubr.msk.f32.mxu0 %vm608_vm12, %v2108_v0 }
 0x1fd   :  { %v299_v44 = vadd.f32 %v298_v43, %v297_v42 }
 0x1ff   :  { %v300_v45 = vrot.slane %v299_v44, 4  ;;  %1872 = vmatmul.mubr.msk.f32.gmra.mrb[4].mxu0 %vm608_vm12, %v2120_v2 }
 0x201   :  { %v301_v46 = vadd.f32 %v300_v45, %v299_v44 }
 0x203   :  { %v302_v47 = vrot.slane %v301_v46, 2 }
 0x205   :  { %v303_v48 = vadd.f32 %v302_v47, %v301_v46 }
 0x207   :  { %v304_v49 = vrot.slane %v303_v48, 1 }
 0x209   :  { %v305_v50 = vadd.f32 %v304_v49, %v303_v48 }
 0x20b   :  { %v306_v51 = vmul.f32 0.0625, %v305_v50 }
 0x20d   :  { %v307_v52 = vadd.f32 1e-05, %v306_v51 }
 0x20f   :  { %2029 = vrsqrt.f32 %v307_v52 }
 0x219   :  { %v2030_v57 = vpop.eup %2029 }
 0x21a   :  { %v309_v58 = vmul.f32 %v2030_v57, %v94_v55 }
 0x21c   :  { %v313_v59 = vrot.slane %v309_v58, %v2244_v56 }
 0x21e   :  { %v314_v63 = vmul.f32 %v313_v59, %v293_v38  ;;  %v315_v4 = vmul.f32 %v313_v59, %v294_v39 }
 0x220   :  { %v320_v6 = vadd.f32 %v1693_v60, %v314_v63  ;;  %v321_v7 = vadd.f32 %v1693_v60, %v315_v4 }
 0x222   :  { %v322_v8 = vmax.f32 %v320_v6, 0.0  ;;  %v323_v9 = vmax.f32 %v321_v7, 0.0 }
 0x224   :  { %v2263_v15 = vadd.f32 %v323_v9, %v2147_v13  ;;  %v2266_v16 = vadd.f32 %v322_v8, %v2149_v14  ;;  %v1981_v13 = vpack.c.bf16 %v1703_v19, %v1702_v20 }
 0x226   :  { %v327_v17 = vmax.f32 %v2263_v15, 0.0  ;;  %v326_v18 = vmax.f32 %v2266_v16, 0.0  ;;  %1982 = vmatprep.subr.bf16.mxu1 %v1981_v13 }
 0x227   :  { %1984 = vmatpush3.bf16.msra.mxu1 %v1981_v13 }
 0x228   :  { %v344_v14 = vrot.slane %v327_v17, 6  ;;  %v343_v21 = vrot.slane %v326_v18, 6  ;;  %1986 = vmatprep.subr.bf16.mxu1 %v1985_v30 }
 0x22a   :  { %v349_v24 = vsel %vm347_vm11, 0.0, %v344_v14  ;;  %v348_v25 = vsel %vm347_vm11, 0.0, %v343_v21  ;;  %v394_v1 = vrot.slane %v344_v14, 2  ;;  %v392_v44 = vrot.slane %v343_v21, 2 }
 0x22b   :  { %388 = vrot.lane.b32.xlu0 %v349_v24, %s2060_s12  ;;  %386 = vrot.lane.b32.xlu1 %v348_v25, %s2060_s12  ;;  %v356_v28 = vrot.slane %v349_v24, 2  ;;  %v354_v29 = vrot.slane %v348_v25, 2  ;;  %v367_v34 = vrot.slane %v349_v24, 4  ;;  %v365_v35 = vrot.slane %v348_v25, 4 }
 0x22c   :  { %1988 = vmatpush3.bf16.msra.mxu1 %v1985_v30  ;;  %v378_v40 = vrot.slane %v349_v24, 6  ;;  %v376_v41 = vrot.slane %v348_v25, 6 }
 0x22d   :  { %v357_v31 = vsel %vm134_vm2, %v353_v23, %v356_v28  ;;  %v355_v32 = vsel %vm134_vm2, %v353_v23, %v354_v29  ;;  %v368_v38 = vsel %vm159_vm3, %v364_v33, %v367_v34  ;;  %v366_v39 = vsel %vm159_vm3, %v364_v33, %v365_v35 }
 0x22e   :  { %v379_v42 = vsel %vm347_vm11, %v375_v36, %v378_v40  ;;  %v377_v43 = vsel %vm347_vm11, %v375_v36, %v376_v41  ;;  %v395_v45 = vsel %vm134_vm2, %v356_v28, %v394_v1  ;;  %v393_v3 = vsel %vm134_vm2, %v354_v29, %v392_v44 }
 0x22f   :  { %360 = vrot.lane.b32.xlu0 %v357_v31, %s2057_s20  ;;  %358 = vrot.lane.b32.xlu1 %v355_v32, %s2057_s20 }
 0x233   :  { %371 = vrot.lane.b32.xlu0 %v368_v38, %s2058_s29  ;;  %369 = vrot.lane.b32.xlu1 %v366_v39, %s2058_s29 }
 0x237   :  { %382 = vrot.lane.b32.xlu0 %v379_v42, %s2059_s30  ;;  %380 = vrot.lane.b32.xlu1 %v377_v43, %s2059_s30 }
 0x23b   :  { %398 = vrot.lane.b32.xlu0 %v395_v45, %s2061_s13  ;;  %396 = vrot.lane.b32.xlu1 %v393_v3, %s2061_s13  ;;  %v96_v45 = vld [vmem:[%s2457_s2 + $0x2] sm:$0x1] }
 0x29d   :  { %v389_v46 = vpop.permute.xlu0 %388  ;;  %v387_v47 = vpop.permute.xlu1 %386 }
 0x2a1   :  { %v361_v48 = vpop.permute.xlu0 %360  ;;  %v359_v49 = vpop.permute.xlu1 %358 }
 0x2a2   :  { %v403_v51 = vsel %vm185_vm5, 0.0, %v361_v48  ;;  %v402_v52 = vsel %vm185_vm5, 0.0, %v359_v49  ;;  %v1708_v48 = vld [vmem:[%s2457_s2 + $0x3] ss:$0 sm:$0xff]  ;;  %s2063_s2 = smov 8  }
 0x2a5   :  { %v372_v0 = vpop.permute.xlu0 %371  ;;  %v370_v50 = vpop.permute.xlu1 %369 }
 0x2a6   :  { %v405_v2 = vsel %vm188_vm6, %v403_v51, %v372_v0  ;;  %v404_v53 = vsel %vm188_vm6, %v402_v52, %v370_v50 }
 0x2a9   :  { %v383_v54 = vpop.permute.xlu0 %382  ;;  %v381_v55 = vpop.permute.xlu1 %380 }
 0x2aa   :  { %v407_v57 = vsel %vm191_vm7, %v405_v2, %v383_v54  ;;  %v406_v58 = vsel %vm191_vm7, %v404_v53, %v381_v55 }
 0x2ab   :  { %v409_v59 = vsel %vm194_vm8, %v407_v57, %v389_v46  ;;  %v408_v62 = vsel %vm194_vm8, %v406_v58, %v387_v47  ;;  %v714_v58 = vld [vmem:[%s2459_s4] sm:$0xff]  ;;  %vm1481_vm8 = vcmask 195584  }
 0x2ac   :  { %1874 = vmatprep.subr.mxu1 %v714_v58 }
 0x2ad   :  { %v399_v60 = vpop.permute.xlu0 %398  ;;  %v397_v61 = vpop.permute.xlu1 %396 }
 0x2ae   :  { %v411_v63 = vsel %vm197_vm9, %v409_v59, %v399_v60  ;;  %v410_v4 = vsel %vm197_vm9, %v408_v62, %v397_v61  ;;  %vm2064_vm9 = vmmov 0  }
 0x2af   :  { %1863 = vmatprep.mubr.msk.f32.mxu1 %vm200_vm10, %v410_v4 }
 0x2b0   :  { %1864 = vmatmul.mubr.msk.f32.vlgmr.msra.gmra.mrb[0].mxu1 %vm200_vm10, %v411_v63  ;;  %vm1579_vm10 = vcmask 31744  }
 0x2b1   :  { %1875 = vmatpush3.msra.mxu1 %v714_v58 }
 0x2ce   :  { %v1870_v6 = vpop.f32.mrb[2].mxu0 }
 0x2cf   :  { %v693_v7 = vadd.f32 %v1870_v6, %v1709_v5  ;;  %v687_v8 = vpop.f32.mrb[3].mxu0 }
 0x2d0   :  { %v688_v9 = vadd.f32 %v1709_v5, %v687_v8 }
 0x2d2   :  { %v1873_v10 = vpop.f32.mrb[4].mxu0 }
 0x2d3   :  { %v703_v11 = vadd.f32 %v1873_v10, %v1709_v5  ;;  %v697_v12 = vpop.f32.mrb[5].mxu0 }
 0x2d4   :  { %v698_v20 = vadd.f32 %v1709_v5, %v697_v12 }
 0x383   :  { %v1865_v19 = vpop.f32.mrb[0].mxu1 }
 0x384   :  { %v494_v13 = vsel %vm185_vm5, %v1865_v19, 0.0  ;;  %v484_v14 = vpop.f32.mrb[1].mxu1 }
 0x385   :  { %v493_v21 = vsel %vm185_vm5, %v484_v14, 0.0 }
 0x386   :  { %v495_v23 = vadd.f32 %v494_v13, %v493_v21 }
 0x388   :  { %v496_v24 = vrot.slane %v495_v23, 4 }
 0x38a   :  { %v497_v25 = vadd.f32 %v496_v24, %v495_v23 }
 0x38c   :  { %v498_v26 = vrot.slane %v497_v25, 2 }
 0x38e   :  { %v499_v27 = vadd.f32 %v498_v26, %v497_v25 }
 0x390   :  { %v500_v28 = vrot.slane %v499_v27, 1 }
 0x392   :  { %v501_v29 = vadd.f32 %v500_v28, %v499_v27 }
 0x394   :  { %v502_v30 = vmul.f32 0.0625, %v501_v29 }
 0x396   :  { %v503_v31 = vsub.f32 %v484_v14, %v502_v30  ;;  %v504_v32 = vsub.f32 %v1865_v19, %v502_v30 }
 0x398   :  { %v505_v33 = vmul.f32 %v503_v31, %v503_v31  ;;  %v506_v34 = vmul.f32 %v504_v32, %v504_v32 }
 0x39a   :  { %v507_v35 = vsel %vm185_vm5, %v505_v33, 0.0  ;;  %v508_v36 = vsel %vm185_vm5, %v506_v34, 0.0 }
 0x39b   :  { %v509_v37 = vadd.f32 %v508_v36, %v507_v35 }
 0x39d   :  { %v510_v38 = vrot.slane %v509_v37, 4 }
 0x39f   :  { %v511_v39 = vadd.f32 %v510_v38, %v509_v37 }
 0x3a1   :  { %v512_v40 = vrot.slane %v511_v39, 2 }
 0x3a3   :  { %v513_v41 = vadd.f32 %v512_v40, %v511_v39 }
 0x3a5   :  { %v514_v42 = vrot.slane %v513_v41, 1 }
 0x3a7   :  { %v515_v43 = vadd.f32 %v514_v42, %v513_v41 }
 0x3a9   :  { %v516_v1 = vmul.f32 0.0625, %v515_v43 }
 0x3ab   :  { %v517_v44 = vadd.f32 1e-05, %v516_v1 }
 0x3ad   :  { %2031 = vrsqrt.f32 %v517_v44 }
 0x3ae   :  { %2033 = vtanh.f32 %v688_v9 }
 0x3af   :  { %2035 = vtanh.f32 %v698_v20 }
 0x3b0   :  { %2037 = vtanh.f32 %v693_v7 }
 0x3b1   :  { %2039 = vtanh.f32 %v703_v11 }
 0x3b7   :  { %v2032_v3 = vpop.eup %2031 }
 0x3b8   :  { %v519_v46 = vmul.f32 %v2032_v3, %v96_v45  ;;  %v2034_v59 = vpop.eup %2033 }
 0x3b9   :  { %v2036_v60 = vpop.eup %2035 }
 0x3ba   :  { %v523_v47 = vrot.slane %v519_v46, %v2244_v56 }
 0x3bc   :  { %v524_v49 = vmul.f32 %v523_v47, %v503_v31  ;;  %v525_v0 = vmul.f32 %v523_v47, %v504_v32 }
 0x3be   :  { %v530_v50 = vadd.f32 %v1708_v48, %v524_v49  ;;  %v531_v51 = vadd.f32 %v1708_v48, %v525_v0 }
 0x3c0   :  { %v532_v52 = vmax.f32 %v530_v50, 0.0  ;;  %v533_v2 = vmax.f32 %v531_v51, 0.0 }
 0x3c2   :  { %v535_v53 = vadd.f32 %v533_v2, %v327_v17  ;;  %v534_v54 = vadd.f32 %v532_v52, %v326_v18  ;;  %v2038_v18 = vpop.eup %2037 }
 0x3c3   :  { %v2040_v4 = vpop.eup %2039 }
 0x3c4   :  { %v537_v55 = vmax.f32 %v535_v53, 0.0  ;;  %v536_v57 = vmax.f32 %v534_v54, 0.0 }
 0x3c6   :  { %570 = vxpose.xlu0.b32.start.end [1/1] (short) (narrow) %v537_v55, 16  ;;  %538 = vxpose.xlu1.b32.start.end [1/1] (short) (narrow) %v536_v57, 16 }
 0x446   :  { %v586_v15 = vpop.trf.xlu0  ;;  %v554_v17 = vpop.trf.xlu1 }
 0x447   :  { %v2353_v16 = vmul.f32 %v2034_v59, %v554_v17  ;;  %v2357_v61 = vmul.f32 %v2036_v60, %v586_v15 }
 0x449   :  { %1876 = vmatprep.mubr.msk.f32.mxu1 %vm608_vm12, %v2353_v16 }
 0x44a   :  { %v555_v62 = vpop.trf.xlu1  ;;  %v587_v5 = vpop.trf.xlu0 }
 0x44b   :  { %v2359_v63 = vmul.f32 %v2038_v18, %v555_v62  ;;  %v2365_v6 = vmul.f32 %v2040_v4, %v587_v5 }
 0x44d   :  { %1877 = vmatmul.mubr.msk.f32.vlgmr.msra.gmra.mrb[2].mxu1 %vm608_vm12, %v2359_v63  ;;  %v2001_v27 = vpack.c.bf16 %v2359_v63, %v2353_v16  ;;  %v2395_v28 = vpack.c.bf16 %v2365_v6, %v2357_v61 }
 0x44e   :  { %1879 = vmatprep.mubr.msk.f32.mxu1 %vm608_vm12, %v2357_v61 }
 0x451   :  { %1880 = vmatmul.mubr.msk.f32.gmra.mrb[4].mxu1 %vm608_vm12, %v2365_v6 }
 0x520   :  { %v1878_v7 = vpop.f32.mrb[2].mxu1 }
 0x521   :  { %v793_v8 = vpop.f32.mrb[3].mxu1  ;;  %v813_v9 = vmul.f32 %v1878_v7, %v1878_v7 }
 0x522   :  { %v1989_v11 = vpack.c.bf16 %v1878_v7, %v793_v8  ;;  %1886 = vmatprep.mubr.msk.f32.mxu0 %vm608_vm12, %v793_v8  ;;  %v812_v12 = vmul.f32 %v793_v8, %v793_v8 }
 0x523   :  { %v819_v20 = vsel %vm608_vm12, %v813_v9, 0.0 }
 0x524   :  { %820 = vadd.xlane.f32.xlu1 %v819_v20  ;;  %v1881_v19 = vpop.f32.mrb[4].mxu1  ;;  %1991 = vmatprep.subr.msk.bf16.mxu0 %vm2371_vm13, %v1989_v11  ;;  %v816_v13 = vsel %vm608_vm12, %v812_v12, 0.0 }
 0x525   :  { %1994 = vmatpush3.bf16.xpose.msk.msra.mxu0 %vm2371_vm13, %v1989_v11  ;;  %817 = vadd.xlane.f32.xlu0 %v816_v13  ;;  %v803_v14 = vpop.f32.mrb[5].mxu1  ;;  %v815_v21 = vmul.f32 %v1881_v19, %v1881_v19 }
 0x526   :  { %v1995_v23 = vpack.c.bf16 %v1881_v19, %v803_v14  ;;  %1893 = vmatprep.mubr.msk.f32.mxu1 %vm608_vm12, %v803_v14  ;;  %v814_v24 = vmul.f32 %v803_v14, %v803_v14 }
 0x527   :  { %v825_v25 = vsel %vm608_vm12, %v815_v21, 0.0 }
 0x528   :  { %826 = vadd.xlane.f32.xlu1 %v825_v25  ;;  %1997 = vmatprep.subr.msk.bf16.mxu1 %vm2371_vm13, %v1995_v23  ;;  %v822_v26 = vsel %vm608_vm12, %v814_v24, 0.0 }
 0x529   :  { %2000 = vmatpush3.bf16.xpose.msk.msra.mxu1 %vm2371_vm13, %v1995_v23  ;;  %823 = vadd.xlane.f32.xlu0 %v822_v26 }
 0x52a   :  { %2002 = vmatprep.subr.bf16.mxu1 %v2001_v27 }
 0x52c   :  { %1887 = vmatmul.mubr.msk.f32.vlgmr.msra.gmra.mrb[6].mxu0 %vm608_vm12, %v1878_v7 }
 0x530   :  { %1894 = vmatmul.mubr.msk.f32.vlgmr.msra.gmra.mrb[6].mxu1 %vm608_vm12, %v1881_v19 }
 0x531   :  { %2004 = vmatpush3.bf16.msra.mxu1 %v2001_v27 }
 0x532   :  { %2006 = vmatprep.subr.bf16.mxu1 %v2395_v28 }
 0x5b1   :  { %v821_v30 = vpop.xlane.xlu1 %820 }
 0x5b2   :  { %v818_v29 = vpop.xlane.xlu0 %817 }
 0x5b3   :  { %990 = vxpose.xlu0.b32.start [1/2] (short) (narrow) %v818_v29, 8 }
 0x5b5   :  { %v827_v32 = vpop.xlane.xlu1 %826 }
 0x5b6   :  { %v824_v31 = vpop.xlane.xlu0 %823 }
 0x5b7   :  { %991 = vxpose.xlu0.b32.end [2/2] (short) (narrow) %v821_v30, 8  ;;  %1022 = vxpose.xlu1.b32.start [1/2] (short) (narrow) %v824_v31, 8 }
 0x5bb   :  { %1023 = vxpose.xlu1.b32.end [2/2] (short) (narrow) %v827_v32, 8 }
 0x5ff   :  { %v1888_v33 = vpop.f32.mrb[6].mxu0 }
 0x600   :  { %v900_v34 = vpop.f32.mrb[7].mxu0  ;;  %v1067_v39 = vmul.f32 2.0, %v1888_v33 }
 0x601   :  { %v1066_v40 = vmul.f32 2.0, %v900_v34 }
 0x603   :  { %v1895_v35 = vpop.f32.mrb[6].mxu1 }
 0x604   :  { %v981_v36 = vpop.f32.mrb[7].mxu1  ;;  %v1069_v49 = vmul.f32 2.0, %v1895_v35 }
 0x605   :  { %v1068_v0 = vmul.f32 2.0, %v981_v36  ;;  %v1478_v36 = vld [vmem:[%s2460_s5] sm:$0xff] }
 0x633   :  { %v1006_v37 = vpop.trf.xlu0 }
 0x634   :  { %v1057_v38 = vrot.slane %v1006_v37, %v2244_v56  ;;  %v1479_v37 = vld [vmem:[%s2460_s5 + $0x8] sm:$0xff] }
 0x636   :  { %v1062_v41 = vadd.f32 %v1057_v38, %v818_v29  ;;  %v1063_v42 = vadd.f32 %v1057_v38, %v821_v30  ;;  %v2017_v38 = vpack.c.bf16 %v1479_v37, %v1478_v36 }
 0x637   :  { %v1038_v43 = vpop.trf.xlu1 }
 0x638   :  { %v1070_v1 = vsub.f32 %v1062_v41, %v1066_v40  ;;  %v1071_v44 = vsub.f32 %v1063_v42, %v1067_v39  ;;  %v1061_v45 = vrot.slane %v1038_v43, %v2244_v56  ;;  %v1480_v39 = vld [vmem:[%s2460_s5 + $0x10] sm:$0xff] }
 0x63a   :  { %v1074_v3 = vmax.f32 %v1070_v1, 0.0  ;;  %v1075_v46 = vmax.f32 %v1071_v44, 0.0  ;;  %v1064_v47 = vadd.f32 %v1061_v45, %v824_v31  ;;  %v1065_v48 = vadd.f32 %v1061_v45, %v827_v32 }
 0x63c   :  { %2041 = vrsqrt.f32 %v1074_v3  ;;  %v1072_v50 = vsub.f32 %v1064_v47, %v1068_v0  ;;  %v1073_v51 = vsub.f32 %v1065_v48, %v1069_v49  ;;  %vm1080_vm14 = vcmp.eq.f32.partialorder %v1074_v3, inf }
 0x63d   :  { %2043 = vrsqrt.f32 %v1075_v46  ;;  %v1083_v57 = vand.u32 2147483648, %v1074_v3  ;;  %vm1082_vm15 = vcmp.eq.f32.partialorder %v1074_v3, 0.0  ;;  %vm1087_vm0 = vcmp.eq.f32.partialorder %v1075_v46, inf }
 0x63e   :  { %v1076_v52 = vmax.f32 %v1072_v50, 0.0  ;;  %v1077_v2 = vmax.f32 %v1073_v51, 0.0  ;;  %v1090_v59 = vand.u32 2147483648, %v1075_v46  ;;  %vm1089_vm1 = vcmp.eq.f32.partialorder %v1075_v46, 0.0 }
 0x640   :  { %2045 = vrsqrt.f32 %v1076_v52  ;;  %vm1094_vm2 = vcmp.eq.f32.partialorder %v1076_v52, inf  ;;  %vm1096_vm4 = vcmp.eq.f32.partialorder %v1076_v52, 0.0  ;;  %v1097_v10 = vand.u32 2147483648, %v1076_v52 }
 0x641   :  { %2047 = vrsqrt.f32 %v1077_v2  ;;  %vm1101_vm6 = vcmp.eq.f32.partialorder %v1077_v2, inf  ;;  %v1104_v20 = vand.u32 2147483648, %v1077_v2  ;;  %vm1103_vm7 = vcmp.eq.f32.partialorder %v1077_v2, 0.0 }
 0x646   :  { %v2042_v53 = vpop.eup %2041 }
 0x647   :  { %v2044_v54 = vpop.eup %2043  ;;  %v1079_v55 = vmul.f32 %v2042_v53, %v1074_v3 }
 0x648   :  { %v1086_v56 = vmul.f32 %v2044_v54, %v1075_v46 }
 0x649   :  { %v1081_v58 = vsel %vm1080_vm14, %v1074_v3, %v1079_v55 }
 0x64a   :  { %v1084_v15 = vsel %vm1082_vm15, %v1083_v57, %v1081_v58  ;;  %v1088_v17 = vsel %vm1087_vm0, %v1075_v46, %v1086_v56  ;;  %v2046_v62 = vpop.eup %2045 }
 0x64b   :  { %v1091_v60 = vsel %vm1089_vm1, %v1090_v59, %v1088_v17  ;;  %v1106_v18 = vsub.f32 0.0, %v1084_v15  ;;  %v2048_v5 = vpop.eup %2047  ;;  %v1093_v8 = vmul.f32 %v2046_v62, %v1076_v52 }
 0x64c   :  { %v1107_v4 = vsub.f32 0.0, %v1091_v60  ;;  %v1100_v11 = vmul.f32 %v2048_v5, %v1077_v2 }
 0x64d   :  { %v1110_v7 = vmul.f32 1.442695, %v1106_v18  ;;  %v1095_v12 = vsel %vm1094_vm2, %v1076_v52, %v1093_v8 }
 0x64e   :  { %v1112_v9 = vmul.f32 1.442695, %v1107_v4  ;;  %v1098_v19 = vsel %vm1096_vm4, %v1097_v10, %v1095_v12  ;;  %v1102_v13 = vsel %vm1101_vm6, %v1077_v2, %v1100_v11 }
 0x64f   :  { %2049 = vpow2.f32 %v1110_v7  ;;  %v1105_v14 = vsel %vm1103_vm7, %v1104_v20, %v1102_v13  ;;  %v1108_v21 = vsub.f32 0.0, %v1098_v19 }
 0x650   :  { %2051 = vpow2.f32 %v1112_v9  ;;  %v1109_v23 = vsub.f32 0.0, %v1105_v14 }
 0x651   :  { %v1114_v24 = vmul.f32 1.442695, %v1108_v21 }
 0x652   :  { %v1116_v25 = vmul.f32 1.442695, %v1109_v23 }
 0x653   :  { %2053 = vpow2.f32 %v1114_v24 }
 0x654   :  { %2055 = vpow2.f32 %v1116_v25 }
 0x659   :  { %v2050_v26 = vpop.eup %2049 }
 0x65a   :  { %v2052_v27 = vpop.eup %2051  ;;  %1900 = vmatprep.mubr.msk.f32.mxu1 %vm185_vm5, %v2050_v26  ;;  %1914 = vmatprep.mubr.msk.f32.mxu0 %vm185_vm5, %v2050_v26 }
 0x65b   :  { %1901 = vmatmul.mubr.msk.f32.vlgmr.msra.gmra.mrb[8].mxu1 %vm185_vm5, %v2052_v27 }
 0x65c   :  { %2008 = vmatpush3.bf16.msra.mxu1 %v2395_v28 }
 0x65d   :  { %v2054_v29 = vpop.eup %2053 }
 0x65e   :  { %v2056_v30 = vpop.eup %2055  ;;  %1907 = vmatprep.mubr.msk.f32.mxu1 %vm185_vm5, %v2054_v29 }
 0x65f   :  { %1908 = vmatmul.mubr.msk.f32.vlgmr.msra.gmra.mrb[10].mxu1 %vm185_vm5, %v2056_v30 }
 0x660   :  { %1921 = vmatprep.mubr.msk.f32.mxu1 %vm185_vm5, %v2054_v29 }
 0x72e   :  { %v1902_v31 = vpop.f32.mrb[8].mxu1 }
 0x72f   :  { %1444 = vrot.lane.b32.xlu1 %v1902_v31, %s2063_s2  ;;  %v1190_v32 = vpop.f32.mrb[9].mxu1 }
 0x730   :  { %v2009_v33 = vpack.c.bf16 %v1902_v31, %v1190_v32  ;;  %1442 = vrot.lane.b32.xlu0 %v1190_v32, %s2063_s2  ;;  %v1738_v31 = vld [vmem:[%s2461_s6 + $0x4] ss:$0 sm:$0xff] }
 0x732   :  { %2010 = vmatprep.subr.bf16.mxu0 %v2009_v33  ;;  %v1909_v34 = vpop.f32.mrb[10].mxu1 }
 0x733   :  { %2012 = vmatpush3.bf16.msra.mxu0 %v2009_v33  ;;  %v1271_v35 = vpop.f32.mrb[11].mxu1 }
 0x734   :  { %1448 = vrot.lane.b32.xlu0 %v1909_v34, %s2063_s2  ;;  %v2013_v28 = vpack.c.bf16 %v1909_v34, %v1271_v35  ;;  %1446 = vrot.lane.b32.xlu1 %v1271_v35, %s2063_s2 }
 0x735   :  { %2018 = vmatprep.subr.bf16.mxu0 %v2017_v38 }
 0x736   :  { %1915 = vmatmul.mubr.msk.f32.vlgmr.msra.gmra.mrb[8].mxu0 %vm185_vm5, %v2052_v27  ;;  %2014 = vmatprep.subr.bf16.mxu1 %v2013_v28 }
 0x737   :  { %2016 = vmatpush3.bf16.msra.mxu1 %v2013_v28  ;;  %2020 = vmatpush3.bf16.msra.mxu0 %v2017_v38 }
 0x738   :  { %1936 = vmatprep.subr.mxu1 %v2062_v22  ;;  %1928 = vmatprep.subr.mxu0 %v1480_v39 }
 0x73a   :  { %1922 = vmatmul.mubr.msk.f32.vlgmr.msra.gmra.mrb[12].mxu1 %vm185_vm5, %v2056_v30 }
 0x73b   :  { %1929 = vmatpush3.msra.mxu0 %v1480_v39  ;;  %1938 = vmatprep.mubr.msk.f32.mxu1 %vm2064_vm9, %v2062_v22 }
 0x7a1   :  { %v1445_v50 = vpop.permute.xlu1 %1444 }
 0x7a2   :  { %v1443_v0 = vpop.permute.xlu0 %1442  ;;  %v1471_v55 = vsel %vm608_vm12, %v2359_v63, %v1445_v50 }
 0x7a3   :  { %v1470_v53 = vsel %vm608_vm12, %v2353_v16, %v1443_v0 }
 0x7a6   :  { %v1449_v51 = vpop.permute.xlu0 %1448  ;;  %v1447_v52 = vpop.permute.xlu1 %1446 }
 0x7a7   :  { %v1472_v59 = vsel %vm608_vm12, %v2357_v61, %v1447_v52  ;;  %v1473_v17 = vsel %vm608_vm12, %v2365_v6, %v1449_v51 }
 0x809   :  { %v1916_v40 = vpop.f32.mrb[8].mxu0 }
 0x80a   :  { %v1431_v41 = vmul.f32 2.0, %v1916_v40  ;;  %v1346_v42 = vpop.f32.mrb[9].mxu0 }
 0x80b   :  { %v1430_v43 = vmul.f32 2.0, %v1346_v42 }
 0x80c   :  { %v1435_v1 = vsub.f32 %v1431_v41, %v2359_v63  ;;  %v1600_v63 = vld [vmem:[%s2461_s6] sm:$0xf] }
 0x80d   :  { %v1434_v44 = vsub.f32 %v1430_v43, %v2353_v16  ;;  %v1923_v45 = vpop.f32.mrb[12].mxu1  ;;  %1937 = vmatpush3.msk.msra.mxu1 %vm159_vm3, %v1600_v63  ;;  %vm1608_vm3 = vcmask 1041409  }
 0x80e   :  { %1460 = vrot.lane.b32.xlu0 %v1435_v1, %s2057_s20  ;;  %v1433_v3 = vmul.f32 2.0, %v1923_v45  ;;  %v1421_v46 = vpop.f32.mrb[13].mxu1 }
 0x80f   :  { %1458 = vrot.lane.b32.xlu1 %v1434_v44, %s2057_s20  ;;  %v1432_v47 = vmul.f32 2.0, %v1421_v46 }
 0x810   :  { %v1437_v48 = vsub.f32 %v1433_v3, %v2365_v6 }
 0x811   :  { %v1436_v49 = vsub.f32 %v1432_v47, %v2357_v61 }
 0x812   :  { %1464 = vrot.lane.b32.xlu0 %v1437_v48, %s2057_s20 }
 0x813   :  { %1462 = vrot.lane.b32.xlu1 %v1436_v49, %s2057_s20 }
 0x880   :  { %v1461_v2 = vpop.permute.xlu0 %1460 }
 0x881   :  { %v1459_v54 = vpop.permute.xlu1 %1458  ;;  %v1475_v56 = vsel %vm185_vm5, %v1471_v55, %v1461_v2 }
 0x882   :  { %v1474_v57 = vsel %vm185_vm5, %v1470_v53, %v1459_v54 }
 0x883   :  { %1930 = vmatprep.mubr.msk.f32.mxu0 %vm1481_vm8, %v1474_v57 }
 0x884   :  { %1931 = vmatmul.mubr.msk.f32.vlgmr.msra.gmra.mrb[10].mxu0 %vm1481_vm8, %v1475_v56  ;;  %v1465_v58 = vpop.permute.xlu0 %1464 }
 0x885   :  { %v1463_v15 = vpop.permute.xlu1 %1462  ;;  %v1477_v60 = vsel %vm185_vm5, %v1473_v17, %v1465_v58 }
 0x886   :  { %v1476_v16 = vsel %vm185_vm5, %v1472_v59, %v1463_v15  ;;  %vm1685_vm5 = vcmask 1024  }
 0x887   :  { %1933 = vmatprep.mubr.msk.f32.mxu0 %vm1481_vm8, %v1476_v16 }
 0x888   :  { %1934 = vmatmul.mubr.msk.f32.gmra.mrb[12].mxu0 %vm1481_vm8, %v1477_v60 }
 0x957   :  { %v1932_v61 = vpop.f32.mrb[10].mxu0 }
 0x958   :  { %v1581_v18 = vsel %vm1579_vm10, %v1932_v61, 0.0  ;;  %v1560_v6 = vpop.f32.mrb[11].mxu0 }
 0x959   :  { %v1580_v62 = vsel %vm1579_vm10, %v1560_v6, 0.0 }
 0x95a   :  { %v1582_v4 = vadd.f32 %v1581_v18, %v1580_v62 }
 0x95b   :  { %v1935_v7 = vpop.f32.mrb[12].mxu0 }
 0x95c   :  { %v1583_v5 = vrot.slane %v1582_v4, 4  ;;  %v1590_v9 = vsel %vm1579_vm10, %v1935_v7, 0.0  ;;  %v1570_v10 = vpop.f32.mrb[13].mxu0 }
 0x95d   :  { %v1589_v11 = vsel %vm1579_vm10, %v1570_v10, 0.0 }
 0x95e   :  { %v1584_v8 = vadd.f32 %v1583_v5, %v1582_v4  ;;  %v1591_v22 = vadd.f32 %v1590_v9, %v1589_v11 }
 0x960   :  { %v1585_v12 = vrot.slane %v1584_v8, 2  ;;  %v1592_v19 = vrot.slane %v1591_v22, 4 }
 0x962   :  { %v1586_v20 = vadd.f32 %v1585_v12, %v1584_v8  ;;  %v1593_v13 = vadd.f32 %v1592_v19, %v1591_v22 }
 0x964   :  { %v1587_v14 = vrot.slane %v1586_v20, 1  ;;  %v1594_v21 = vrot.slane %v1593_v13, 2 }
 0x966   :  { %v1595_v23 = vadd.f32 %v1594_v21, %v1593_v13  ;;  %v1588_v24 = vadd.f32 %v1587_v14, %v1586_v20 }
 0x968   :  { %v1596_v25 = vrot.slane %v1595_v23, 1  ;;  %v1598_v27 = vmul.f32 0.0625, %v1588_v24 }
 0x96a   :  { %v1597_v26 = vadd.f32 %v1596_v25, %v1595_v23 }
 0x96c   :  { %v1599_v29 = vmul.f32 0.0625, %v1597_v26 }
 0x96e   :  { %v1609_v30 = vsel %vm1608_vm3, %v1599_v29, %v1598_v27 }
 0x96f   :  { %1939 = vmatmul.mubr.msk.f32.vlgmr.msra.gmra.mrb[14].mxu1 %vm1579_vm10, %v1609_v30 }
 0xa42   :  { %v1681_v32 = vpop.f32.mrb[14].mxu1 }
 0xa43   :  { %v1682_v33 = vadd.f32 %v1738_v31, %v1681_v32  ;;  %v1940_v34 = vpop.f32.mrb[15].mxu1 }
 0xa45   :  { %1686 = vst.msk [vmem:[%s2462_s7] sm:$0x3] %vm1685_vm5, %v1682_v33 }

</bundles_post_ra>
